<compile_context>
chip_gen: v7x
topology: tpu7x:2x2x1
jax: 0.10.0
libtpu: 0.0.40
codegen_flags: <defaults>
</compile_context>

<pallas_src>
import functools

import jax
import jax.numpy as jnp
from jax.experimental import pallas as pl
from jax.experimental.pallas import tpu as pltpu


def _local_attn_kernel(p_ref, q_ref, o_ref, *, n_q, s_win):
    """One grid step == one batch tile.

    p_ref : (Bt, 1)      predictive alignment position p_t per batch element (f32)
    q_ref : (Bt, Qs, N)  queries in the original PyTorch layout (channel-major)
    o_ref : (Bt, Qs)     output summary vectors s_t
    """
    p_t = p_ref[...]                                   # (Bt, 1) f32
    q = q_ref[...]                                     # (Bt, Qs, N) f32
    bt = q.shape[0]
    size = n_q + 1                                     # padded length (NaN pad at 0)

    p_round = jnp.round(p_t).astype(jnp.int32)         # (Bt, 1)

    # lane iota over the (unpadded) query-position axis
    lane_iota = jax.lax.broadcasted_iota(jnp.int32, (bt, 1, n_q), 2)   # (Bt,1,N)

    # matches torch's integer `s_win // 2` divisor (window==1 -> div-by-0 -> inf,
    # same as torch; no guard added on purpose)
    half = float(s_win // 2)

    acc = jnp.zeros((bt, q.shape[1]), jnp.float32)     # (Bt, Qs)
    for w in range(s_win):                             # static, s_win is tiny
        off = w - s_win // 2 + 1
        # s_i = fmod(clamp(round(p_t)+off, 0, size), size)
        idx = jnp.clip(p_round + off, 0, size)                         # (Bt,1)
        idx = jnp.where(idx == size, 0, idx)                           # fmod by size
        oob = idx == 0                                                 # pad row hit
        col = idx - 1                                                  # unpadded column; -1 if oob

        # one-hot gather of the window column, vectorized across the batch tile.
        # when oob, col = -1 matches no lane -> q_w is exactly 0 (== NaN row zeroed).
        sel = lane_iota == col[:, :, None]                             # (Bt,1,N)
        q_w = jnp.sum(jnp.where(sel, q, 0.0), axis=-1)                 # (Bt, Qs)

        # gaussian window weighting around p_t
        s_loc = jnp.maximum(col, 0).astype(jnp.float32)                # clamp(s_i-1, 0)
        s_exp = 2.0 * jnp.square((s_loc - p_t) / half)                 # (Bt,1)

        # faithful nn.Softmax(dim=2) over a singleton dim after the -inf masking:
        # finite score -> 1.0, OOB (-inf) -> NaN, exactly like torch.
        # (assumes real query data is NaN-free in channel 0, same as the module's trick)
        sm = jnp.where(oob, jnp.nan, 1.0)                              # (Bt,1)
        w_attn = sm * jnp.exp(-s_exp)                                  # (Bt,1)

        acc = acc + w_attn * q_w                                       # weighted sum

    o_ref[...] = acc


def local_attention_1d(q_i, c_t, w_a, w_p, v_p, *, window=2):
    """q_i: (B, query_size, num_queries) f32 (PyTorch convention)
       c_t: (B, context_size) f32
       w_a: (context_size, query_size), w_p: (align_size, context_size),
       v_p: (1, align_size)  — PyTorch nn.Linear weight shapes (bias=False).
       returns s_t: (B, query_size)

    Note: w_a is accepted for API parity with the module but is not needed by the
    forward output (the Luong score only affects the result through finiteness)."""
    del w_a  # dead in the forward pass (see header comment)
    B, Qs, N = q_i.shape
    size = N + 1

    # predictive alignment head, hoisted: one batched XLA matmul chain
    loc = jax.nn.sigmoid(jnp.tanh(c_t @ w_p.T) @ v_p.T)                # (B, 1)
    p_t = (loc * jnp.float32(size - 2)).astype(jnp.float32)            # (B, 1)

    # batch tile: collapse small batches to a single grid step; cap for VMEM
    # (budgeted well under v7x's 64 MiB physical / 32 MiB scoped VMEM).
    b_tile = B if B <= 256 else 256
    grid = (pl.cdiv(B, b_tile),)

    kernel = functools.partial(_local_attn_kernel, n_q=N, s_win=window)

    out = pl.pallas_call(
        kernel,
        out_shape=jax.ShapeDtypeStruct((B, Qs), jnp.float32),
        grid_spec=pltpu.PrefetchScalarGridSpec(
            num_scalar_prefetch=0,
            grid=grid,
            in_specs=[
                pl.BlockSpec((b_tile, 1), lambda b: (b, 0)),           # p_t
                pl.BlockSpec((b_tile, Qs, N), lambda b: (b, 0, 0)),    # q_i (original layout)
            ],
            out_specs=pl.BlockSpec((b_tile, Qs), lambda b: (b, 0)),
        ),
        compiler_params=pltpu.CompilerParams(
            dimension_semantics=("parallel",)),
    )(p_t, q_i)
    return out


def local_attention_1d_ref(q_i, c_t, w_a, w_p, v_p, *, window=2):
    """Pure-JAX reference mirroring the PyTorch forward (incl. the NaN-pad and
    the Luong score / singleton-softmax machinery), for verification."""
    B, Qs, N = q_i.shape
    size = N + 1
    q_pad = jnp.concatenate(
        [jnp.full((B, Qs, 1), jnp.nan, q_i.dtype), q_i], axis=2)
    loc = jax.nn.sigmoid(jnp.tanh(c_t @ w_p.T) @ v_p.T)[:, 0]
    p_t = loc * (size - 2)
    p_round = jnp.round(p_t).astype(jnp.int32)
    offs = jnp.arange(window) - window // 2 + 1
    s_i = jnp.clip(p_round[:, None] + offs[None, :], 0, size)
    s_i = jnp.where(s_i == size, 0, s_i)
    s_exp = 2.0 * ((jnp.maximum(s_i - 1, 0).astype(jnp.float32)
                    - p_t[:, None]) / float(window // 2)) ** 2
    q_t = jnp.transpose(q_pad, (0, 2, 1))                              # (B, size, Q)
    q_g = jnp.take_along_axis(q_t, s_i[:, :, None], axis=1)            # (B, win, Q)
    nan_loc = jnp.isnan(q_g[..., 0])
    q_g = jnp.where(nan_loc[..., None], 0.0, q_g)
    a_t = jnp.einsum('bwq,cq,bc->bw', q_g, w_a, c_t)
    a_t = jnp.where(nan_loc, -jnp.inf, a_t)
    z = jnp.exp(a_t - a_t)
    sm = z / z
    w_attn = sm * jnp.exp(-s_exp)
    return jnp.einsum('bw,bwq->bq', w_attn, q_g)


if __name__ == "__main__":
    B, Qs, N, C, P, win = 2, 8, 16, 8, 4, 2

    key = jax.random.PRNGKey(0)
    k1, k2, k3, k4, k5 = jax.random.split(key, 5)
    q_i = jax.random.normal(k1, (B, Qs, N), jnp.float32)
    c_t = jax.random.normal(k2, (B, C), jnp.float32)
    # deterministic synthetic Linear weights (PyTorch weight shapes, no bias)
    w_a = jax.random.normal(k3, (C, Qs), jnp.float32) / jnp.sqrt(Qs)
    w_p = jax.random.normal(k4, (P, C), jnp.float32) / jnp.sqrt(C)
    v_p = jax.random.normal(k5, (1, P), jnp.float32) / jnp.sqrt(P)

    s_t = local_attention_1d(q_i, c_t, w_a, w_p, v_p, window=win)
    s_t = jax.block_until_ready(s_t)

    ref = local_attention_1d_ref(q_i, c_t, w_a, w_p, v_p, window=win)
    assert s_t.shape == (B, Qs)
    assert bool(jnp.allclose(s_t, ref, atol=1e-5, rtol=1e-5, equal_nan=True))
    print("KERNEL_OK")
</pallas_src>

<mosaic_0001>
module attributes {stable_mosaic.version = 11 : i64} {
  func.func @_local_attn_kernel(%arg0: i32, %arg1: memref<2x1xf32, #tpu.memory_space<vmem>>, %arg2: memref<2x8x16xf32, #tpu.memory_space<vmem>>, %arg3: memref<2x8xf32, #tpu.memory_space<vmem>>) attributes {dimension_semantics = [#tpu.dimension_semantics<parallel>], iteration_bounds = array<i64: 1>, scalar_prefetch = 0 : i64, scratch_operands = 0 : i64, tpu.core_type = #tpu.core_type<tc>, window_params = [{transform_indices = @transform_0, window_bounds = array<i64: 2, 1>}, {transform_indices = @transform_1, window_bounds = array<i64: 2, 8, 16>}, {transform_indices = @transform_2, window_bounds = array<i64: 2, 8>}]} {
    %c0 = arith.constant 0 : index
    %c0_0 = arith.constant 0 : index
    %0 = vector.load %arg1[%c0, %c0_0] : memref<2x1xf32, #tpu.memory_space<vmem>>, vector<2x1xf32>
    %c0_1 = arith.constant 0 : index
    %c0_2 = arith.constant 0 : index
    %c0_3 = arith.constant 0 : index
    %1 = vector.load %arg2[%c0_1, %c0_2, %c0_3] : memref<2x8x16xf32, #tpu.memory_space<vmem>>, vector<2x8x16xf32>
    %2 = math.roundeven %0 : vector<2x1xf32>
    %3 = arith.fptosi %2 : vector<2x1xf32> to vector<2x1xi32>
    %4 = tpu.iota {dimensions = array<i32: 2>} : vector<2x1x16xi32>
    %cst = arith.constant 0.000000e+00 : f32
    %5 = vector.broadcast %cst : f32 to vector<2x8xf32>
    %c0_i32 = arith.constant 0 : i32
    %6 = vector.broadcast %c0_i32 : i32 to vector<2x1xi32>
    %7 = arith.addi %3, %6 : vector<2x1xi32>
    %c0_i32_4 = arith.constant 0 : i32
    %c17_i32 = arith.constant 17 : i32
    %8 = vector.broadcast %c0_i32_4 : i32 to vector<2x1xi32>
    %9 = arith.maxsi %8, %7 : vector<2x1xi32>
    %10 = vector.broadcast %c17_i32 : i32 to vector<2x1xi32>
    %11 = arith.minsi %10, %9 : vector<2x1xi32>
    %c17_i32_5 = arith.constant 17 : i32
    %12 = vector.broadcast %c17_i32_5 : i32 to vector<2x1xi32>
    %13 = arith.cmpi eq, %11, %12 : vector<2x1xi32>
    %c0_i32_6 = arith.constant 0 : i32
    %14 = vector.broadcast %c0_i32_6 : i32 to vector<2x1xi32>
    %15 = arith.select %13, %14, %11 : vector<2x1xi1>, vector<2x1xi32>
    %c0_i32_7 = arith.constant 0 : i32
    %16 = vector.broadcast %c0_i32_7 : i32 to vector<2x1xi32>
    %17 = arith.cmpi eq, %15, %16 : vector<2x1xi32>
    %c1_i32 = arith.constant 1 : i32
    %18 = vector.broadcast %c1_i32 : i32 to vector<2x1xi32>
    %19 = arith.subi %15, %18 : vector<2x1xi32>
    %20 = vector.shape_cast %19 : vector<2x1xi32> to vector<2x1x1xi32>
    %21 = vector.broadcast %20 : vector<2x1x1xi32> to vector<2x1x16xi32>
    %22 = arith.cmpi eq, %4, %21 : vector<2x1x16xi32>
    %cst_8 = arith.constant 0.000000e+00 : f32
    %23 = vector.shape_cast %22 : vector<2x1x16xi1> to vector<2x1x16xi1>
    %24 = vector.broadcast %23 : vector<2x1x16xi1> to vector<2x8x16xi1>
    %25 = vector.broadcast %cst_8 : f32 to vector<2x8x16xf32>
    %26 = arith.select %24, %1, %25 : vector<2x8x16xi1>, vector<2x8x16xf32>
    %cst_9 = arith.constant dense<0.000000e+00> : vector<2x8xf32>
    %27 = vector.multi_reduction <add>, %26, %cst_9 [2] : vector<2x8x16xf32> to vector<2x8xf32>
    %c0_i32_10 = arith.constant 0 : i32
    %28 = vector.broadcast %c0_i32_10 : i32 to vector<2x1xi32>
    %29 = arith.maxsi %19, %28 : vector<2x1xi32>
    %30 = arith.sitofp %29 : vector<2x1xi32> to vector<2x1xf32>
    %31 = arith.subf %30, %0 : vector<2x1xf32>
    %cst_11 = arith.constant 1.000000e+00 : f32
    %32 = vector.broadcast %cst_11 : f32 to vector<2x1xf32>
    %33 = arith.divf %31, %32 : vector<2x1xf32>
    %34 = arith.mulf %33, %33 : vector<2x1xf32>
    %cst_12 = arith.constant 2.000000e+00 : f32
    %35 = vector.broadcast %cst_12 : f32 to vector<2x1xf32>
    %36 = arith.mulf %35, %34 : vector<2x1xf32>
    %cst_13 = arith.constant 0x7FC00000 : f32
    %cst_14 = arith.constant 1.000000e+00 : f32
    %37 = vector.broadcast %cst_13 : f32 to vector<2x1xf32>
    %38 = vector.broadcast %cst_14 : f32 to vector<2x1xf32>
    %39 = arith.select %17, %37, %38 : vector<2x1xi1>, vector<2x1xf32>
    %cst_15 = arith.constant 0.000000e+00 : f32
    %40 = vector.broadcast %cst_15 : f32 to vector<2x1xf32>
    %41 = arith.subf %40, %36 : vector<2x1xf32>
    %42 = math.exp %41 : vector<2x1xf32>
    %43 = arith.mulf %39, %42 : vector<2x1xf32>
    %44 = vector.broadcast %43 : vector<2x1xf32> to vector<2x8xf32>
    %45 = arith.mulf %44, %27 : vector<2x8xf32>
    %46 = arith.addf %5, %45 : vector<2x8xf32>
    %c1_i32_16 = arith.constant 1 : i32
    %47 = vector.broadcast %c1_i32_16 : i32 to vector<2x1xi32>
    %48 = arith.addi %3, %47 : vector<2x1xi32>
    %c0_i32_17 = arith.constant 0 : i32
    %c17_i32_18 = arith.constant 17 : i32
    %49 = vector.broadcast %c0_i32_17 : i32 to vector<2x1xi32>
    %50 = arith.maxsi %49, %48 : vector<2x1xi32>
    %51 = vector.broadcast %c17_i32_18 : i32 to vector<2x1xi32>
    %52 = arith.minsi %51, %50 : vector<2x1xi32>
    %c17_i32_19 = arith.constant 17 : i32
    %53 = vector.broadcast %c17_i32_19 : i32 to vector<2x1xi32>
    %54 = arith.cmpi eq, %52, %53 : vector<2x1xi32>
    %c0_i32_20 = arith.constant 0 : i32
    %55 = vector.broadcast %c0_i32_20 : i32 to vector<2x1xi32>
    %56 = arith.select %54, %55, %52 : vector<2x1xi1>, vector<2x1xi32>
    %c0_i32_21 = arith.constant 0 : i32
    %57 = vector.broadcast %c0_i32_21 : i32 to vector<2x1xi32>
    %58 = arith.cmpi eq, %56, %57 : vector<2x1xi32>
    %c1_i32_22 = arith.constant 1 : i32
    %59 = vector.broadcast %c1_i32_22 : i32 to vector<2x1xi32>
    %60 = arith.subi %56, %59 : vector<2x1xi32>
    %61 = vector.shape_cast %60 : vector<2x1xi32> to vector<2x1x1xi32>
    %62 = vector.broadcast %61 : vector<2x1x1xi32> to vector<2x1x16xi32>
    %63 = arith.cmpi eq, %4, %62 : vector<2x1x16xi32>
    %cst_23 = arith.constant 0.000000e+00 : f32
    %64 = vector.shape_cast %63 : vector<2x1x16xi1> to vector<2x1x16xi1>
    %65 = vector.broadcast %64 : vector<2x1x16xi1> to vector<2x8x16xi1>
    %66 = vector.broadcast %cst_23 : f32 to vector<2x8x16xf32>
    %67 = arith.select %65, %1, %66 : vector<2x8x16xi1>, vector<2x8x16xf32>
    %cst_24 = arith.constant dense<0.000000e+00> : vector<2x8xf32>
    %68 = vector.multi_reduction <add>, %67, %cst_24 [2] : vector<2x8x16xf32> to vector<2x8xf32>
    %c0_i32_25 = arith.constant 0 : i32
    %69 = vector.broadcast %c0_i32_25 : i32 to vector<2x1xi32>
    %70 = arith.maxsi %60, %69 : vector<2x1xi32>
    %71 = arith.sitofp %70 : vector<2x1xi32> to vector<2x1xf32>
    %72 = arith.subf %71, %0 : vector<2x1xf32>
    %cst_26 = arith.constant 1.000000e+00 : f32
    %73 = vector.broadcast %cst_26 : f32 to vector<2x1xf32>
    %74 = arith.divf %72, %73 : vector<2x1xf32>
    %75 = arith.mulf %74, %74 : vector<2x1xf32>
    %cst_27 = arith.constant 2.000000e+00 : f32
    %76 = vector.broadcast %cst_27 : f32 to vector<2x1xf32>
    %77 = arith.mulf %76, %75 : vector<2x1xf32>
    %cst_28 = arith.constant 0x7FC00000 : f32
    %cst_29 = arith.constant 1.000000e+00 : f32
    %78 = vector.broadcast %cst_28 : f32 to vector<2x1xf32>
    %79 = vector.broadcast %cst_29 : f32 to vector<2x1xf32>
    %80 = arith.select %58, %78, %79 : vector<2x1xi1>, vector<2x1xf32>
    %cst_30 = arith.constant 0.000000e+00 : f32
    %81 = vector.broadcast %cst_30 : f32 to vector<2x1xf32>
    %82 = arith.subf %81, %77 : vector<2x1xf32>
    %83 = math.exp %82 : vector<2x1xf32>
    %84 = arith.mulf %80, %83 : vector<2x1xf32>
    %85 = vector.broadcast %84 : vector<2x1xf32> to vector<2x8xf32>
    %86 = arith.mulf %85, %68 : vector<2x8xf32>
    %87 = arith.addf %46, %86 : vector<2x8xf32>
    %c0_31 = arith.constant 0 : index
    %c0_32 = arith.constant 0 : index
    %88 = vector.load %arg3[%c0_31, %c0_32] : memref<2x8xf32, #tpu.memory_space<vmem>>, vector<2x8xf32>
    tpu.vector_store %arg3[%c0_31, %c0_32], %87 {strides = array<i32>} : memref<2x8xf32, #tpu.memory_space<vmem>>, vector<2x8xf32>,
    return
  }
  func.func @transform_0(%arg0: i32) -> (i32, i32) {
    %c0_i32 = arith.constant 0 : i32
    %c0_i32_0 = arith.constant 0 : i32
    return %arg0, %c0_i32 : i32, i32
  }
  func.func @transform_1(%arg0: i32) -> (i32, i32, i32) {
    %c0_i32 = arith.constant 0 : i32
    %c0_i32_0 = arith.constant 0 : i32
    %c0_i32_1 = arith.constant 0 : i32
    return %arg0, %c0_i32, %c0_i32_0 : i32, i32, i32
  }
  func.func @transform_2(%arg0: i32) -> (i32, i32) {
    %c0_i32 = arith.constant 0 : i32
    %c0_i32_0 = arith.constant 0 : i32
    return %arg0, %c0_i32 : i32, i32
  }
}

</mosaic_0001>

<bundles_post_ra>
// kernel: tpu_custom_call.1
= control target key start
LH: loop header
LB: loop body
LE: loop exit
PB: predicated region body
PF: predicated region fallthrough
CT: control target
= control target key end

     0   :  { %7 = vsyncpa [#allocation3], 0  ;;  %s356_s0 = inlined_call_operand.vmem [shape: f32[2,1], index: 0, kind: input, shape index: {}]   ;;  %s357_s1 = inlined_call_operand.hbm [shape: f32[2,8,16], index: 1, kind: input, shape index: {}]   ;;  %s358_s2 = inlined_call_operand.hbm [shape: f32[2,8], index: 2, kind: output, shape index: {}]  }
   0x1   :  { %8 = vsyncpa [#allocation4], 0  ;;  %s298_s9 = smov [#allocation2]   ;;  %s250_s13 = scalar_lea.hbm %s357_s1, 256 }
   0x2   :  { %s16_s10 = sshll.u32 %s298_s9, 4  ;;  %p251_p0 = scmp.ne.s32.totalorder %s357_s1, %s250_s13  ;;  %s17_s10 = int_to_ptr.vmem [resolvable:$true] %s16_s10 }
   0x3   :  { %p254_p1 = scmp.lt.u32.totalorder %s250_s13, %s357_s1 }
   0x5   :  { %p256_p2 = pnand %p254_p1, %p251_p0 }
   0x7   :  { %259 = shalt.err (!%p256_p2)
}
   0x8   :  { %s260_s18 = scalar_lea.vmem %s17_s10, 256  ;;  %p265_p4 = scmp.lt.s32.totalorder %s17_s10, %s17_s10 }
   0x9   :  { %p261_p3 = scmp.ne.s32.totalorder %s17_s10, %s260_s18  ;;  %p266_p5 = scmp.lt.s32.totalorder %s260_s18, %s260_s18 }
   0xb   :  { %p267_p6 = por %p266_p5, %p265_p4 }
   0xd   :  { %p268_p7 = pnand %p267_p6, %p261_p3 }
   0xf   :  { %271 = shalt.err (!%p268_p7)
}
  0x10   :  { %s299_s19 = smov 128   ;;  %s300_s20 = smov 8  }
  0x11   :  { %22 = dma.hbm_to_vmem [thread:$0]  %s357_s1, 256, %s17_s10, [#allocation3], %s299_s19, %s299_s19, %s300_s20  }
  0x12   :  { %294 = dma.done.wait [#allocation3], 256  }
  0x13   :  { %295 = vsyncadd [#allocation3], 4294967040  ;;  %v301_v0 = vmov 0   ;;  %v30_v1 = vlaneseq  ;;  %v302_v2 = vmov 1966171168   ;;  %v303_v40 = vmov 1.0  }
  0x14   :  { %244 = vset.pattern.permute.xlu0 %v301_v0  ;;  %245 = vset.pattern.permute.xlu1 %v301_v0  ;;  %v41_v3 = vunpack.c.l.s4 %v302_v2  ;;  %v26_v4 = vld [vmem:[%s356_s0] sm:$0x3]  ;;  %vm84_vm10 = vcmask 130048   ;;  %v28_v58 = vld [vmem:[#allocation2 + $0x8] sm:$0xff]  ;;  %vm117_vm15 = vcmask 1041409   ;;  %s304_s0 = smov [#allocation5]  }
  0x15   :  { %v236_v5 = vcvt.f32.s32 %v26_v4  ;;  %v335_v7 = vshrl.u32 %v30_v1, 7  ;;  %v31_v48 = vand.u32 127, %v30_v1  ;;  %v27_v51 = vld [vmem:[#allocation2] sm:$0xff]  ;;  %s219_s1 = sshll.u32 %s304_s0, 4  ;;  %s220_s1 = int_to_ptr.vmem [resolvable:$true] %s219_s1 }
  0x16   :  { %v42_v6 = vunpack.c.0.s8 %v41_v3  ;;  %s272_s25 = scalar_lea.vmem %s220_s1, 32  ;;  %p277_p9 = scmp.lt.s32.totalorder %s220_s1, %s220_s1 }
  0x17   :  { %vm32_vm0 = vcmp.gt.s32.totalorder %v236_v5, 0  ;;  %v122_v8 = vadd.s32 1, %v236_v5  ;;  %v67_v47 = vsub.s32 0, %v335_v7  ;;  %p273_p8 = scmp.ne.s32.totalorder %s220_s1, %s272_s25  ;;  %p278_p10 = scmp.lt.s32.totalorder %s272_s25, %s272_s25 }
  0x18   :  { %v33_v9 = vsel %vm32_vm0, %v236_v5, 0  ;;  %v45_v12 = vsub.s32 %v42_v6, %v335_v7  ;;  %v111_v6 = vsub.s32 %v31_v48, %v335_v7  ;;  %vm211_vm0 = vcmask 58368  }
  0x19   :  { %vm34_vm1 = vcmp.lt.s32.totalorder %v33_v9, 17  ;;  %vm123_vm2 = vcmp.gt.s32.totalorder %v122_v8, 0  ;;  %p279_p11 = por %p278_p10, %p277_p9 }
  0x1a   :  { %v35_v10 = vsel %vm34_vm1, %v33_v9, 17  ;;  %v124_v11 = vsel %vm123_vm2, %v122_v8, 0 }
  0x1b   :  { %vm36_vm3 = vcmp.eq.s32.totalorder %v35_v10, 17  ;;  %vm125_vm4 = vcmp.lt.s32.totalorder %v124_v11, 17  ;;  %p280_p12 = pnand %p279_p11, %p273_p8 }
  0x1c   :  { %v37_v13 = vsel %vm36_vm3, 0, %v35_v10  ;;  %v126_v14 = vsel %vm125_vm4, %v124_v11, 17 }
  0x1d   :  { %v228_v15 = vadd.s32 4294967295, %v37_v13  ;;  %vm127_vm5 = vcmp.eq.s32.totalorder %v126_v14, 17  ;;  %vm38_vm8 = vcmp.eq.s32.totalorder %v37_v13, 0 }
  0x1e   :  { %v128_v16 = vsel %vm127_vm5, 0, %v126_v14  ;;  %v97_v41 = vsel %vm38_vm8, nan, %v303_v40 }
  0x1f   :  { %v46_v17 = vrot.slane %v228_v15, %v45_v12  ;;  %vm91_vm6 = vcmp.gt.s32.totalorder %v228_v15, 0  ;;  %v229_v18 = vcvt.s32.f32 %v228_v15  ;;  %v231_v19 = vadd.s32 4294967295, %v128_v16 }
  0x20   :  { %vm129_vm9 = vcmp.eq.s32.totalorder %v128_v16, 0 }
  0x21   :  { %v54_v20 = vrot.slane %v46_v17, %v45_v12  ;;  %v230_v21 = vsel %vm91_vm6, %v229_v18, 0.0  ;;  %v47_v22 = vcombine.high %v46_v17, %v46_v17  ;;  %v137_v23 = vrot.slane %v231_v19, %v45_v12 }
  0x22   :  { %v94_v24 = vsub.f32 %v230_v21, %v26_v4  ;;  %vm181_vm7 = vcmp.gt.s32.totalorder %v231_v19, 0  ;;  %v232_v25 = vcvt.s32.f32 %v231_v19  ;;  %v187_v44 = vsel %vm129_vm9, nan, %v303_v40 }
  0x23   :  { %63 = vperm.xlu0 %244, %v54_v20   ;;  %v145_v26 = vrot.slane %v137_v23, %v45_v12  ;;  %v138_v27 = vcombine.high %v137_v23, %v137_v23  ;;  %v61_v28 = vrot.slane %v47_v22, %v45_v12 }
  0x24   :  { %v95_v29 = vmul.f32 %v94_v24, %v94_v24  ;;  %v233_v30 = vsel %vm181_vm7, %v232_v25, 0.0 }
  0x25   :  { %v184_v31 = vsub.f32 %v233_v30, %v26_v4  ;;  %154 = vperm.xlu1 %245, %v145_v26   ;;  %v152_v32 = vrot.slane %v138_v27, %v45_v12 }
  0x26   :  { %v96_v33 = vmul.f32 2.0, %v95_v29 }
  0x27   :  { %70 = vperm.xlu0 %244, %v61_v28   ;;  %v185_v35 = vmul.f32 %v184_v31, %v184_v31 }
  0x28   :  { %v98_v34 = vsub.f32 0.0, %v96_v33 }
  0x29   :  { %161 = vperm.xlu1 %245, %v152_v32   ;;  %v186_v37 = vmul.f32 2.0, %v185_v35 }
  0x2a   :  { %v99_v36 = vmul.f32 1.442695, %v98_v34 }
  0x2b   :  { %v188_v38 = vsub.f32 0.0, %v186_v37 }
  0x2c   :  { %246 = vpow2.f32 %v99_v36 }
  0x2d   :  { %v189_v39 = vmul.f32 1.442695, %v188_v38 }
  0x2f   :  { %248 = vpow2.f32 %v189_v39 }
  0x36   :  { %v247_v42 = vpop.eup %246 }
  0x37   :  { %v101_v43 = vmul.f32 %v247_v42, %v97_v41 }
  0x39   :  { %v249_v45 = vpop.eup %248 }
  0x3a   :  { %v191_v46 = vmul.f32 %v249_v45, %v187_v44 }
  0xa2   :  { %v64_v49 = vpop.permute.xlu0 %63 }
  0xa3   :  { %v68_v50 = vrot.slane %v64_v49, %v67_v47 }
  0xa4   :  { %v155_v52 = vpop.permute.xlu1 %154 }
  0xa5   :  { %v159_v53 = vrot.slane %v155_v52, %v67_v47  ;;  %vm76_vm11 = vcmp.eq.s32.totalorder %v31_v48, %v68_v50 }
  0xa6   :  { %v71_v54 = vpop.permute.xlu0 %70  ;;  %v82_v55 = vsel %vm76_vm11, %v27_v51, 0.0 }
  0xa7   :  { %v75_v56 = vrot.slane %v71_v54, %v67_v47  ;;  %v85_v57 = vsel %vm84_vm10, %v82_v55, 0.0  ;;  %vm167_vm12 = vcmp.eq.s32.totalorder %v31_v48, %v159_v53 }
  0xa8   :  { %v162_v59 = vpop.permute.xlu1 %161  ;;  %86 = vadd.xlane.f32.xlu0 %v85_v57  ;;  %v173_v60 = vsel %vm167_vm12, %v27_v51, 0.0 }
  0xa9   :  { %v166_v61 = vrot.slane %v162_v59, %v67_v47  ;;  %v175_v62 = vsel %vm84_vm10, %v173_v60, 0.0  ;;  %vm77_vm13 = vcmp.eq.s32.totalorder %v31_v48, %v75_v56 }
  0xaa   :  { %v83_v63 = vsel %vm77_vm13, %v28_v58, 0.0 }
  0xab   :  { %v88_v0 = vsel %vm84_vm10, %v83_v63, 0.0  ;;  %vm168_vm14 = vcmp.eq.s32.totalorder %v31_v48, %v166_v61 }
  0xac   :  { %176 = vadd.xlane.f32.xlu0 %v175_v62  ;;  %89 = vadd.xlane.f32.xlu1 %v88_v0  ;;  %v174_v1 = vsel %vm168_vm14, %v28_v58, 0.0 }
  0xad   :  { %v178_v2 = vsel %vm84_vm10, %v174_v1, 0.0 }
  0xb0   :  { %179 = vadd.xlane.f32.xlu0 %v178_v2 }
  0xbd   :  { %104 = vperm.xlu1 %245, %v101_v43  }
  0xc6   :  { %194 = vperm.xlu0 %244, %v191_v46  }
 0x135   :  { %v87_v3 = vpop.xlane.xlu0 %86 }
 0x136   :  { %v112_v10 = vrot.slane %v87_v3, %v111_v6 }
 0x139   :  { %v177_v4 = vpop.xlane.xlu0 %176  ;;  %v90_v5 = vpop.xlane.xlu1 %89 }
 0x13a   :  { %v116_v9 = vrot.slane %v90_v5, %v111_v6  ;;  %v202_v12 = vrot.slane %v177_v4, %v111_v6 }
 0x13c   :  { %v118_v13 = vsel %vm117_vm15, %v116_v9, %v112_v10 }
 0x13d   :  { %v180_v8 = vpop.xlane.xlu0 %179  ;;  %v105_v14 = vpop.permute.xlu1 %104 }
 0x13e   :  { %v206_v11 = vrot.slane %v180_v8, %v111_v6  ;;  %v120_v17 = vmul.f32 %v118_v13, %v105_v14 }
 0x140   :  { %v207_v15 = vsel %vm117_vm15, %v206_v11, %v202_v12 }
 0x145   :  { %v195_v16 = vpop.permute.xlu0 %194 }
 0x146   :  { %v209_v18 = vmul.f32 %v207_v15, %v195_v16 }
 0x148   :  { %v210_v19 = vadd.f32 %v209_v18, %v120_v17 }
 0x14a   :  { %212 = vst.msk [vmem:[#allocation5] sm:$0x3] %vm211_vm0, %v210_v19 }
 0x14b   :  { %283 = shalt.err (!%p280_p12)
}
 0x14c   :  { %s284_s28 = scalar_lea.hbm %s358_s2, 32 }
 0x14d   :  { %p285_p13 = scmp.ne.s32.totalorder %s358_s2, %s284_s28  ;;  %p288_p0 = scmp.lt.u32.totalorder %s284_s28, %s358_s2 }
 0x14f   :  { %p290_p1 = pnand %p288_p0, %p285_p13 }
 0x151   :  { %293 = shalt.err (!%p290_p1)
}
 0x152   :  { %222 = dma.vmem_to_hbm [thread:$0]  %s220_s1, 32, %s358_s2, [#allocation4]  }
 0x153   :  { %296 = dma.done.wait [#allocation4], 32  }
 0x154   :  { %297 = vsyncadd [#allocation4], 4294967264 }
 0x155   :  { %226 = vsyncpa [#allocation3], 1 }
 0x156   :  { %227 = vsyncpa [#allocation4], 1 }

</bundles_post_ra>
